<compile_context>
chip_gen: v6e
topology: v6e:2x2x1
jax: 0.10.0
libtpu: 0.0.40
codegen_flags: <defaults>
</compile_context>

<pallas_src>
import math
import functools

import jax
import jax.numpy as jnp
from jax.experimental import pallas as pl
from jax.experimental.pallas import tpu as pltpu


# ---------------------------------------------------------------------------
# Parameter / buffer construction (plain JAX glue, matches nn.Module.__init__)
# ---------------------------------------------------------------------------
def make_positional_encoding(d_model: int, max_len: int = 512,
                             dtype=jnp.float32) -> jnp.ndarray:
    """Builds the `pe` buffer of shape [max_len, 1, d_model]."""
    position = jnp.arange(max_len, dtype=jnp.float32)[:, None]          # [L,1]
    div_term = jnp.exp(jnp.arange(0, d_model, 2, dtype=jnp.float32)
                       * (-math.log(3000.0) / d_model))                 # [D/2]
    pe = jnp.zeros((max_len, 1, d_model), dtype=jnp.float32)
    pe = pe.at[:, 0, 0::2].set(jnp.sin(position * div_term))
    pe = pe.at[:, 0, 1::2].set(jnp.cos(position * div_term))
    return pe.astype(dtype)


# ---------------------------------------------------------------------------
# Pallas kernels (elementwise hot path: add + optional dropout)
# ---------------------------------------------------------------------------
def _pe_add_kernel(x_ref, pe_ref, o_ref):
    # x_ref: (ts, B, D), pe_ref: (ts, 1, D) -> broadcast add over batch.
    o_ref[...] = x_ref[...] + pe_ref[...]


def _pe_add_dropout_kernel(x_ref, pe_ref, u_ref, o_ref, *, p: float):
    # Inverted dropout after the positional add.  u_ref holds uniform [0,1)
    # randoms of the same block shape as x; keep iff u >= p.
    y = (x_ref[...] + pe_ref[...]).astype(jnp.float32)
    keep = u_ref[...] >= jnp.float32(p)
    scale = jnp.float32(1.0 / (1.0 - p))          # scale kept in f32 (no bf16 bias)
    o_ref[...] = jnp.where(keep, y * scale, jnp.float32(0.0)).astype(o_ref.dtype)


# ---------------------------------------------------------------------------
# Wrapper
# ---------------------------------------------------------------------------
def _seq_tile(S: int, B: int, D: int, itemsize: int,
              target_block_bytes: int = 1 << 20) -> int:
    """Pick a seq-tile so each (ts, B, D) block is ~1 MiB (fits double-buffered
    pipelines inside v5e's 16 MiB scoped-VMEM default, ~85% of HBM roofline)."""
    bytes_per_row = max(1, B * D * itemsize)
    return max(1, min(S, target_block_bytes // bytes_per_row))


def positional_encoding_forward(x: jnp.ndarray, pe: jnp.ndarray,
                                *, dropout_p: float = 0.1,
                                training: bool = False,
                                rng_key=None) -> jnp.ndarray:
    """x: [seq_len, batch, d_model]; pe: [max_len, 1, d_model]."""
    S, B, D = x.shape
    assert pe.ndim == 3 and pe.shape[0] >= S and pe.shape[1] == 1 and pe.shape[2] == D

    # Cast pe once in the wrapper (halves pe DMA traffic for bf16 activations,
    # removes a per-step VPU cast from the kernel).
    pe = pe.astype(x.dtype)

    ts = _seq_tile(S, B, D, x.dtype.itemsize)
    grid = (pl.cdiv(S, ts),)

    x_spec = pl.BlockSpec((ts, B, D), lambda i: (i, 0, 0))
    # Full pe buffer is passed; BlockSpec DMAs only the rows of the current
    # seq tile (no dynamic_slice copy in HBM beforehand).
    pe_spec = pl.BlockSpec((ts, 1, D), lambda i: (i, 0, 0))
    out_spec = pl.BlockSpec((ts, B, D), lambda i: (i, 0, 0))

    cparams = pltpu.CompilerParams(dimension_semantics=("parallel",))
    xbytes = x.size * x.dtype.itemsize
    pebytes = S * D * pe.dtype.itemsize

    if (not training) or dropout_p <= 0.0:
        return pl.pallas_call(
            _pe_add_kernel,
            out_shape=jax.ShapeDtypeStruct((S, B, D), x.dtype),
            grid_spec=pltpu.PrefetchScalarGridSpec(
                num_scalar_prefetch=0,
                grid=grid,
                in_specs=[x_spec, pe_spec],
                out_specs=out_spec,
            ),
            compiler_params=cparams,
            cost_estimate=pl.CostEstimate(
                flops=S * B * D, transcendentals=0,
                bytes_accessed=2 * xbytes + pebytes),
        )(x, pe)

    # Training mode.
    if dropout_p >= 1.0:                       # torch dropout(p=1) -> all zeros
        return jnp.zeros_like(x)

    if rng_key is None:
        rng_key = jax.random.PRNGKey(0)
    # TODO(synk): on real TPU hardware this uniform buffer could be replaced by
    # in-kernel pltpu.prng_random_bits to avoid the extra HBM read, but that
    # primitive does not lower in CPU interpret mode.
    u = jax.random.uniform(rng_key, (S, B, D), dtype=jnp.float32)
    u_spec = pl.BlockSpec((ts, B, D), lambda i: (i, 0, 0))

    kernel = functools.partial(_pe_add_dropout_kernel, p=float(dropout_p))
    return pl.pallas_call(
        kernel,
        out_shape=jax.ShapeDtypeStruct((S, B, D), x.dtype),
        grid_spec=pltpu.PrefetchScalarGridSpec(
            num_scalar_prefetch=0,
            grid=grid,
            in_specs=[x_spec, pe_spec, u_spec],
            out_specs=out_spec,
        ),
        compiler_params=cparams,
        cost_estimate=pl.CostEstimate(
            flops=4 * S * B * D, transcendentals=0,
            bytes_accessed=2 * xbytes + pebytes + u.size * 4),
    )(x, pe, u)


# ---------------------------------------------------------------------------
# Demo / self-check
# ---------------------------------------------------------------------------
if __name__ == "__main__":
    d_model = 32
    max_len = 512
    seq_len = 8
    batch = 2
    p = 0.1

    key = jax.random.PRNGKey(0)
    kx, kdrop = jax.random.split(key)
    x = jax.random.normal(kx, (seq_len, batch, d_model), dtype=jnp.float32)

    pe = make_positional_encoding(d_model, max_len=max_len)
    y_ref = x + pe[:seq_len]

    # Eval mode (dropout is identity) — check against pure-JAX reference.
    y = positional_encoding_forward(x, pe, dropout_p=p, training=False)
    y = jax.block_until_ready(y)
    assert y.shape == (seq_len, batch, d_model)
    assert jnp.allclose(y, y_ref, atol=1e-6, rtol=1e-6), "mismatch vs reference"

    # Training mode (inverted dropout) — every element is either 0 or the
    # positional-encoded value scaled by 1/(1-p).
    y_tr = positional_encoding_forward(x, pe, dropout_p=p, training=True,
                                       rng_key=kdrop)
    y_tr = jax.block_until_ready(y_tr)
    assert y_tr.shape == (seq_len, batch, d_model)
    is_zero = y_tr == 0.0
    is_scaled = jnp.isclose(y_tr, y_ref * jnp.float32(1.0 / (1.0 - p)), atol=1e-5)
    assert bool(jnp.all(is_zero | is_scaled)), "dropout output malformed"

    print("KERNEL_OK")
</pallas_src>

<mosaic_0001>
module attributes {stable_mosaic.version = 11 : i64} {
  func.func @_pe_add_kernel(%arg0: i32, %arg1: memref<8x2x32xf32, #tpu.memory_space<vmem>>, %arg2: memref<8x1x32xf32, #tpu.memory_space<vmem>>, %arg3: memref<8x2x32xf32, #tpu.memory_space<vmem>>) attributes {dimension_semantics = [#tpu.dimension_semantics<parallel>], iteration_bounds = array<i64: 1>, scalar_prefetch = 0 : i64, scratch_operands = 0 : i64, tpu.core_type = #tpu.core_type<tc>, window_params = [{transform_indices = @transform_0, window_bounds = array<i64: 8, 2, 32>}, {transform_indices = @transform_1, window_bounds = array<i64: 8, 1, 32>}, {transform_indices = @transform_2, window_bounds = array<i64: 8, 2, 32>}]} {
    %c0 = arith.constant 0 : index
    %c0_0 = arith.constant 0 : index
    %c0_1 = arith.constant 0 : index
    %0 = vector.load %arg1[%c0, %c0_0, %c0_1] : memref<8x2x32xf32, #tpu.memory_space<vmem>>, vector<8x2x32xf32>
    %c0_2 = arith.constant 0 : index
    %c0_3 = arith.constant 0 : index
    %c0_4 = arith.constant 0 : index
    %1 = vector.load %arg2[%c0_2, %c0_3, %c0_4] : memref<8x1x32xf32, #tpu.memory_space<vmem>>, vector<8x1x32xf32>
    %2 = vector.broadcast %1 : vector<8x1x32xf32> to vector<8x2x32xf32>
    %3 = arith.addf %0, %2 : vector<8x2x32xf32>
    %c0_5 = arith.constant 0 : index
    %c0_6 = arith.constant 0 : index
    %c0_7 = arith.constant 0 : index
    %4 = vector.load %arg3[%c0_5, %c0_6, %c0_7] : memref<8x2x32xf32, #tpu.memory_space<vmem>>, vector<8x2x32xf32>
    tpu.vector_store %arg3[%c0_5, %c0_6, %c0_7], %3 {strides = array<i32>} : memref<8x2x32xf32, #tpu.memory_space<vmem>>, vector<8x2x32xf32>,
    return
  }
  func.func @transform_0(%arg0: i32) -> (i32, i32, i32) {
    %c0_i32 = arith.constant 0 : i32
    %c0_i32_0 = arith.constant 0 : i32
    %c0_i32_1 = arith.constant 0 : i32
    return %arg0, %c0_i32, %c0_i32_0 : i32, i32, i32
  }
  func.func @transform_1(%arg0: i32) -> (i32, i32, i32) {
    %c0_i32 = arith.constant 0 : i32
    %c0_i32_0 = arith.constant 0 : i32
    %c0_i32_1 = arith.constant 0 : i32
    return %arg0, %c0_i32, %c0_i32_0 : i32, i32, i32
  }
  func.func @transform_2(%arg0: i32) -> (i32, i32, i32) {
    %c0_i32 = arith.constant 0 : i32
    %c0_i32_0 = arith.constant 0 : i32
    %c0_i32_1 = arith.constant 0 : i32
    return %arg0, %c0_i32, %c0_i32_0 : i32, i32, i32
  }
}

</mosaic_0001>

<bundles_post_ra>
// kernel: tpu_custom_call.1
= control target key start
LH: loop header
LB: loop body
LE: loop exit
PB: predicated region body
PF: predicated region fallthrough
CT: control target
= control target key end

     0   :  { %vm84_vm0 = vcmask 254976   ;;  %s219_s0 = inlined_call_operand.vmem [shape: f32[8,2,32], index: 0, kind: input, shape index: {}]   ;;  %s220_s1 = inlined_call_operand.vmem [shape: f32[512,1,32], index: 1, kind: input, shape index: {}]   ;;  %s221_s2 = inlined_call_operand.hbm [shape: f32[8,2,32], index: 2, kind: output, shape index: {}]  }
   0x1   :  { %v12_v0 = vld [vmem:[%s219_s0] sm:$0x3]  ;;  %v13_v3 = vld [vmem:[%s219_s0 + $0x2] sm:$0x3]  ;;  %v14_v5 = vld [vmem:[%s219_s0 + $0x4] sm:$0x3] }
   0x2   :  { %v109_v1 = vld [vmem:[%s220_s1] ss:$0 sm:$0xff]  ;;  %v110_v4 = vld [vmem:[%s220_s1 + $0x1] ss:$0 sm:$0xff]  ;;  %v111_v7 = vld [vmem:[%s220_s1 + $0x2] ss:$0 sm:$0xff] }
   0x3   :  { %v76_v2 = vadd.f32 %v109_v1, %v12_v0  ;;  %v77_v6 = vadd.f32 %v110_v4, %v13_v3  ;;  %v15_v8 = vld [vmem:[%s219_s0 + $0x6] sm:$0x3]  ;;  %v112_v9 = vld [vmem:[%s220_s1 + $0x3] ss:$0 sm:$0xff]  ;;  %v78_v10 = vadd.f32 %v111_v7, %v14_v5  ;;  %v16_v12 = vld [vmem:[%s219_s0 + $0x8] sm:$0x3] }
   0x4   :  { %v79_v11 = vadd.f32 %v112_v9, %v15_v8  ;;  %v113_v13 = vld [vmem:[%s220_s1 + $0x4] ss:$0 sm:$0xff]  ;;  %v17_v14 = vld [vmem:[%s219_s0 + $0xa] sm:$0x3]  ;;  %v114_v16 = vld [vmem:[%s220_s1 + $0x5] ss:$0 sm:$0xff] }
   0x5   :  { %85 = vst.msk [vmem:[#allocation2] sm:$0x3] %vm84_vm0, %v76_v2  ;;  %86 = vst.msk [vmem:[#allocation2 + $0x2] sm:$0x3] %vm84_vm0, %v77_v6  ;;  %v80_v15 = vadd.f32 %v113_v13, %v16_v12  ;;  %v18_v17 = vld [vmem:[%s219_s0 + $0xc] sm:$0x3]  ;;  %v81_v19 = vadd.f32 %v114_v16, %v17_v14 }
   0x6   :  { %v115_v18 = vld [vmem:[%s220_s1 + $0x6] ss:$0 sm:$0xff]  ;;  %87 = vst.msk [vmem:[#allocation2 + $0x4] sm:$0x3] %vm84_vm0, %v78_v10  ;;  %88 = vst.msk [vmem:[#allocation2 + $0x6] sm:$0x3] %vm84_vm0, %v79_v11 }
   0x7   :  { %v82_v20 = vadd.f32 %v115_v18, %v18_v17  ;;  %v19_v21 = vld [vmem:[%s219_s0 + $0xe] sm:$0x3]  ;;  %v116_v22 = vld [vmem:[%s220_s1 + $0x7] ss:$0 sm:$0xff] }
   0x8   :  { %7 = vsyncpa [#allocation3], 0  ;;  %89 = vst.msk [vmem:[#allocation2 + $0x8] sm:$0x3] %vm84_vm0, %v80_v15  ;;  %v83_v23 = vadd.f32 %v116_v22, %v19_v21  ;;  %s142_s13 = smov [#allocation2]  }
   0x9   :  { %s98_s14 = sshll.u32 %s142_s13, 4  ;;  %90 = vst.msk [vmem:[#allocation2 + $0xa] sm:$0x3] %vm84_vm0, %v81_v19  ;;  %91 = vst.msk [vmem:[#allocation2 + $0xc] sm:$0x3] %vm84_vm0, %v82_v20  ;;  %s99_s14 = int_to_ptr.vmem [resolvable:$true] %s98_s14 }
   0xa   :  { %92 = vst.msk [vmem:[#allocation2 + $0xe] sm:$0x3] %vm84_vm0, %v83_v23  ;;  %s120_s15 = scalar_lea.vmem %s99_s14, 256  ;;  %p125_p1 = scmp.lt.s32.totalorder %s99_s14, %s99_s14 }
   0xb   :  { %p121_p0 = scmp.ne.s32.totalorder %s99_s14, %s120_s15  ;;  %p126_p2 = scmp.lt.s32.totalorder %s120_s15, %s120_s15 }
   0xd   :  { %p127_p3 = por %p126_p2, %p125_p1 }
   0xf   :  { %p128_p4 = pnand %p127_p3, %p121_p0 }
  0x11   :  { %131 = shalt.err (!%p128_p4)
}
  0x12   :  { %s143_s0 = smov 32   ;;  %s144_s1 = smov 2  }
  0x13   :  { %104 = dma.vmem_to_hbm [thread:$0]  %s99_s14, 256, %s221_s2, [#allocation3], %s143_s0, %s143_s0, %s144_s1  }
  0x14   :  { %140 = dma.done.wait [#allocation3], 256  }
  0x15   :  { %141 = vsyncadd [#allocation3], 4294967040 }
  0x16   :  { %108 = vsyncpa [#allocation3], 1 }

</bundles_post_ra>
